<compile_context>
chip_gen: v7x
topology: tpu7x:2x2x1
jax: 0.10.0
libtpu: 0.0.40
codegen_flags: <defaults>
</compile_context>

<pallas_src>
import math

import jax
import jax.numpy as jnp
from jax.experimental import pallas as pl
from jax.experimental.pallas import tpu as pltpu

EPS = 1e-5
VMEM_LIMIT_BYTES = 32 * 1024 * 1024   # safe on v5e/v6e (128 MiB) and v7x (64 MiB)


def _round_up(n, m):
    return ((n + m - 1) // m) * m


def _cdiv(a, b):
    return (a + b - 1) // b


# --------------------------- pass 1: stats of x ------------------------------
def _x_stats_kernel(x_ref, s_ref):
    @pl.when(pl.program_id(1) == 0)
    def _():
        s_ref[...] = jnp.zeros_like(s_ref)

    x = x_ref[...]
    # VPU accumulate + one sublane fold; padded rows are zeros -> contribute 0.
    s_ref[0:1, :] += jnp.sum(x, axis=0, keepdims=True)
    s_ref[1:2, :] += jnp.sum(x * x, axis=0, keepdims=True)


# ------------------- pass 2: stats of h1 = layer1(relu(norm1(x))) ------------
def _h1_stats_kernel(x_ref, a1_ref, c1_ref, w1_ref, b1_ref, s_ref):
    @pl.when(pl.program_id(1) == 0)
    def _():
        s_ref[...] = jnp.zeros_like(s_ref)

    x = x_ref[...]
    h = jnp.maximum(x * a1_ref[...] + c1_ref[...], 0.0)              # norm1 + ReLU
    h1 = jnp.dot(h, w1_ref[...], preferred_element_type=jnp.float32) + b1_ref[...]
    # Padded rows' constant contribution is subtracted in the wrapper.
    s_ref[0:1, :] += jnp.sum(h1, axis=0, keepdims=True)
    s_ref[1:2, :] += jnp.sum(h1 * h1, axis=0, keepdims=True)


# -------------- pass 3: norm2 + ReLU + layer2 + residual + add ---------------
def _output_kernel(x_ref, a1_ref, c1_ref, a2_ref, c2_ref,
                   w1_ref, b1_ref, w2_ref, b2_ref, win_ref, bin_ref, out_ref):
    x = x_ref[...]
    h = jnp.maximum(x * a1_ref[...] + c1_ref[...], 0.0)              # norm1 + ReLU
    h1 = jnp.dot(h, w1_ref[...], preferred_element_type=jnp.float32) + b1_ref[...]
    h2 = jnp.maximum(h1 * a2_ref[...] + c2_ref[...], 0.0)            # norm2 + ReLU
    o = jnp.dot(h2, w2_ref[...], preferred_element_type=jnp.float32) + b2_ref[...]
    # Residual path fused here: the x tile is already VMEM-resident.
    o = o + jnp.dot(x, win_ref[...], preferred_element_type=jnp.float32) + bin_ref[...]
    out_ref[...] = o.astype(out_ref.dtype)


# --------------------------------- wrapper -----------------------------------
def _fold_bn(sum_c, sumsq_c, gamma, beta, n):
    """Fold BatchNorm (batch stats + affine) into a single scale/shift pair."""
    mean = sum_c / n
    var = jnp.maximum(sumsq_c / n - mean * mean, 0.0)
    a = gamma * jax.lax.rsqrt(var + EPS)
    c = beta - mean * a
    return a, c


def residual_block(x, params, *, tile_rows=16384):
    """x: (B, S, Cin) float32. Returns (B, S, Cout)."""
    B, S, Cin = x.shape
    Cout = params["w1"].shape[1]
    N = B * S

    # Lane-packing group size: pack G consecutive rows into the lane dim so
    # G*Cin and G*Cout are multiples of 128 (lane-dense vregs / stores, full-K
    # MXU).  Fall back to G=1 for wide channels.
    def _grp(c):
        return 128 // math.gcd(128, c)

    G = _grp(Cin) * _grp(Cout) // math.gcd(_grp(Cin), _grp(Cout))
    if G * max(Cin, Cout) > 512:
        G = 1
    Lin, Lout = G * Cin, G * Cout

    x2d = x.reshape(N, Cin).astype(jnp.float32)

    # Row tiling (in packed rows).  Keep an even number of row tiles so the
    # stats passes can split across 2 TensorCores; only zero rows are padded.
    Ng = _cdiv(N, G)
    tile_cap = _round_up(_cdiv(tile_rows, G), 8)
    nt_pairs = _cdiv(Ng, 2 * tile_cap)
    tile_g = _round_up(_cdiv(Ng, 2 * nt_pairs), 8)
    Ng_p = 2 * nt_pairs * tile_g
    nt = 2 * nt_pairs
    Np = Ng_p * G
    if Np != N:
        x2d = jnp.pad(x2d, ((0, Np - N), (0, 0)))
    xp = x2d.reshape(Ng_p, Lin)                 # free row-major lane-packed view

    # Block-diagonal packed weights / lane-tiled row vectors.
    def bd(w):
        return w if G == 1 else jnp.kron(jnp.eye(G, dtype=w.dtype), w)

    def tl(v):
        return v if G == 1 else jnp.tile(v, (1, G))

    w1p, w2p, winp = bd(params["w1"]), bd(params["w2"]), bd(params["win"])
    b1p, b2p, binp = tl(params["b1"]), tl(params["b2"]), tl(params["bin"])

    x_spec_stats = pl.BlockSpec((tile_g, Lin),
                                lambda c, i, nh=nt_pairs: (c * nh + i, 0))
    x_spec_out = pl.BlockSpec((tile_g, Lin), lambda i: (i, 0))

    def cst2(shape):        # const operand, 2-D grid (VMEM-resident across grid)
        return pl.BlockSpec(shape, lambda c, i: (0, 0))

    def cst1(shape):        # const operand, 1-D grid
        return pl.BlockSpec(shape, lambda i: (0, 0))

    cp_stats = pltpu.CompilerParams(dimension_semantics=("parallel", "arbitrary"),
                                    vmem_limit_bytes=VMEM_LIMIT_BYTES)
    cp_out = pltpu.CompilerParams(dimension_semantics=("parallel",),
                                  vmem_limit_bytes=VMEM_LIMIT_BYTES)

    # ---- pass 1: per-(group,channel) sum / sumsq of x (per-core partials) ----
    stats1 = pl.pallas_call(
        _x_stats_kernel,
        grid=(2, nt_pairs),
        in_specs=[x_spec_stats],
        out_specs=pl.BlockSpec((None, 2, Lin), lambda c, i: (c, 0, 0)),
        out_shape=jax.ShapeDtypeStruct((2, 2, Lin), jnp.float32),
        compiler_params=cp_stats,
    )(xp)

    s1 = stats1.sum(axis=0).reshape(2, G, Cin).sum(axis=1)      # fold cores + groups
    a1, c1 = _fold_bn(s1[0:1], s1[1:2], params["g1"], params["be1"], N)
    a1p, c1p = tl(a1), tl(c1)

    # ---- pass 2: per-(group,channel) sum / sumsq of h1 (not materialized) ----
    stats2 = pl.pallas_call(
        _h1_stats_kernel,
        grid=(2, nt_pairs),
        in_specs=[x_spec_stats,
                  cst2((1, Lin)), cst2((1, Lin)),
                  cst2((Lin, Lout)), cst2((1, Lout))],
        out_specs=pl.BlockSpec((None, 2, Lout), lambda c, i: (c, 0, 0)),
        out_shape=jax.ShapeDtypeStruct((2, 2, Lout), jnp.float32),
        compiler_params=cp_stats,
    )(xp, a1p, c1p, w1p, b1p)

    s2 = stats2.sum(axis=0).reshape(2, G, Cout).sum(axis=1)
    # Every padded (all-zero) x row contributes relu(c1) @ w1 + b1 to the h1
    # stats; subtract that closed-form contribution instead of in-kernel masks.
    n_pad = Np - N
    h1_pad = jnp.maximum(c1, 0.0) @ params["w1"] + params["b1"]
    sum2 = s2[0:1] - n_pad * h1_pad
    sumsq2 = s2[1:2] - n_pad * h1_pad * h1_pad
    a2, c2 = _fold_bn(sum2, sumsq2, params["g2"], params["be2"], N)
    a2p, c2p = tl(a2), tl(c2)

    # ---- pass 3: full forward per row tile + residual, lane-dense output ----
    outp = pl.pallas_call(
        _output_kernel,
        grid=(nt,),
        in_specs=[x_spec_out,
                  cst1((1, Lin)), cst1((1, Lin)),
                  cst1((1, Lout)), cst1((1, Lout)),
                  cst1((Lin, Lout)), cst1((1, Lout)),
                  cst1((Lout, Lout)), cst1((1, Lout)),
                  cst1((Lin, Lout)), cst1((1, Lout))],
        out_specs=pl.BlockSpec((tile_g, Lout), lambda i: (i, 0)),
        out_shape=jax.ShapeDtypeStruct((Ng_p, Lout), x.dtype),
        compiler_params=cp_out,
    )(xp, a1p, c1p, a2p, c2p, w1p, b1p, w2p, b2p, winp, binp)

    out2d = outp.reshape(Np, Cout)              # free row-major un-pack
    if Np != N:
        out2d = out2d[:N]
    return out2d.reshape(B, S, Cout)


# ------------------------------ pure-JAX reference ---------------------------
def reference_forward(x, params):
    """Mirrors the PyTorch module in training mode (batch BN stats)."""
    B, S, Cin = x.shape
    x2d = x.reshape(B * S, Cin).astype(jnp.float32)

    mean1 = jnp.mean(x2d, axis=0, keepdims=True)
    var1 = jnp.mean((x2d - mean1) ** 2, axis=0, keepdims=True)
    o = (x2d - mean1) / jnp.sqrt(var1 + EPS) * params["g1"] + params["be1"]
    o = jnp.maximum(o, 0.0)
    o = o @ params["w1"] + params["b1"]

    mean2 = jnp.mean(o, axis=0, keepdims=True)
    var2 = jnp.mean((o - mean2) ** 2, axis=0, keepdims=True)
    o = (o - mean2) / jnp.sqrt(var2 + EPS) * params["g2"] + params["be2"]
    o = jnp.maximum(o, 0.0)
    o = o @ params["w2"] + params["b2"]

    xi = x2d @ params["win"] + params["bin"]
    return (xi + o).reshape(B, S, -1)


def init_params(key, in_channel, out_channel):
    """Deterministic synthetic parameters (PyTorch-like uniform init ranges)."""
    ks = jax.random.split(key, 6)
    s1 = 1.0 / jnp.sqrt(in_channel)
    s2 = 1.0 / jnp.sqrt(out_channel)
    return {
        # Linear weights stored as (in, out) so the kernel does x @ W.
        "w1": jax.random.uniform(ks[0], (in_channel, out_channel), jnp.float32, -s1, s1),
        "b1": jax.random.uniform(ks[1], (1, out_channel), jnp.float32, -s1, s1),
        "w2": jax.random.uniform(ks[2], (out_channel, out_channel), jnp.float32, -s2, s2),
        "b2": jax.random.uniform(ks[3], (1, out_channel), jnp.float32, -s2, s2),
        "win": jax.random.uniform(ks[4], (in_channel, out_channel), jnp.float32, -s1, s1),
        "bin": jax.random.uniform(ks[5], (1, out_channel), jnp.float32, -s1, s1),
        # BatchNorm affine params (PyTorch default init: weight=1, bias=0).
        "g1": jnp.ones((1, in_channel), jnp.float32),
        "be1": jnp.zeros((1, in_channel), jnp.float32),
        "g2": jnp.ones((1, out_channel), jnp.float32),
        "be2": jnp.zeros((1, out_channel), jnp.float32),
    }


if __name__ == "__main__":
    key = jax.random.PRNGKey(0)
    kx, kp, kx2 = jax.random.split(key, 3)

    B, S, Cin, Cout = 2, 8, 16, 32
    params = init_params(kp, Cin, Cout)

    # Test 1: small shape, single tile pair, default (large) tile setting.
    x = jax.random.normal(kx, (B, S, Cin), dtype=jnp.float32)
    out = jax.block_until_ready(residual_block(x, params))
    ref = reference_forward(x, params)
    assert out.shape == (B, S, Cout)
    assert jnp.allclose(out, ref, atol=1e-4, rtol=1e-4), "mismatch vs reference (test 1)"

    # Test 2: multi-tile grid with a ragged final tile (exercises the per-core
    # stats accumulators, the padded-row correction and the output slice).
    B2, S2 = 4, 100
    x2 = jax.random.normal(kx2, (B2, S2, Cin), dtype=jnp.float32)
    out2 = jax.block_until_ready(residual_block(x2, params, tile_rows=64))
    ref2 = reference_forward(x2, params)
    assert out2.shape == (B2, S2, Cout)
    assert jnp.allclose(out2, ref2, atol=1e-4, rtol=1e-4), "mismatch vs reference (test 2)"

    print("KERNEL_OK")
</pallas_src>

<mosaic_0001>
module attributes {stable_mosaic.version = 11 : i64} {
  func.func @_x_stats_kernel(%arg0: i32, %arg1: i32, %arg2: memref<8x128xf32, #tpu.memory_space<vmem>>, %arg3: memref<1x2x128xf32, #tpu.memory_space<vmem>>) attributes {dimension_semantics = [#tpu.dimension_semantics<parallel>, #tpu.dimension_semantics<arbitrary>], iteration_bounds = array<i64: 2, 1>, scalar_prefetch = 0 : i64, scratch_operands = 0 : i64, tpu.core_type = #tpu.core_type<tc>, window_params = [{transform_indices = @transform_0, window_bounds = array<i64: 8, 128>}, {transform_indices = @transform_1, window_bounds = array<i64: 1, 2, 128>}]} {
    %c0_i32 = arith.constant 0 : i32
    %0 = arith.cmpi eq, %arg1, %c0_i32 : i32
    %1 = arith.extui %0 : i1 to i32
    %c0_i32_0 = arith.constant 0 : i32
    %2 = arith.cmpi ne, %1, %c0_i32_0 : i32
    scf.if %2 {
      %cst_14 = arith.constant 0.000000e+00 : f32
      %21 = vector.broadcast %cst_14 : f32 to vector<2x128xf32>
      %c0_15 = arith.constant 0 : index
      %c0_16 = arith.constant 0 : index
      %c0_17 = arith.constant 0 : index
      %22 = vector.load %arg3[%c0_15, %c0_16, %c0_17] : memref<1x2x128xf32, #tpu.memory_space<vmem>>, vector<1x2x128xf32>
      %23 = vector.shape_cast %22 : vector<1x2x128xf32> to vector<2x128xf32>
      %24 = vector.shape_cast %21 : vector<2x128xf32> to vector<1x2x128xf32>
      tpu.vector_store %arg3[%c0_15, %c0_16, %c0_17], %24 {strides = array<i32>} : memref<1x2x128xf32, #tpu.memory_space<vmem>>, vector<1x2x128xf32>,
    } else {
    }
    %c0 = arith.constant 0 : index
    %c0_1 = arith.constant 0 : index
    %3 = vector.load %arg2[%c0, %c0_1] : memref<8x128xf32, #tpu.memory_space<vmem>>, vector<8x128xf32>
    %c0_2 = arith.constant 0 : index
    %c0_3 = arith.constant 0 : index
    %c0_4 = arith.constant 0 : index
    %4 = vector.load %arg3[%c0_2, %c0_3, %c0_4] : memref<1x2x128xf32, #tpu.memory_space<vmem>>, vector<1x1x128xf32>
    %5 = vector.shape_cast %4 : vector<1x1x128xf32> to vector<1x128xf32>
    %cst = arith.constant dense<0.000000e+00> : vector<128xf32>
    %6 = vector.multi_reduction <add>, %3, %cst [0] : vector<8x128xf32> to vector<128xf32>
    %7 = vector.shape_cast %6 : vector<128xf32> to vector<1x128xf32>
    %8 = arith.addf %5, %7 : vector<1x128xf32>
    %c0_5 = arith.constant 0 : index
    %c0_6 = arith.constant 0 : index
    %c0_7 = arith.constant 0 : index
    %9 = vector.load %arg3[%c0_5, %c0_6, %c0_7] : memref<1x2x128xf32, #tpu.memory_space<vmem>>, vector<1x1x128xf32>
    %10 = vector.shape_cast %9 : vector<1x1x128xf32> to vector<1x128xf32>
    %11 = vector.shape_cast %8 : vector<1x128xf32> to vector<1x1x128xf32>
    tpu.vector_store %arg3[%c0_5, %c0_6, %c0_7], %11 {strides = array<i32>} : memref<1x2x128xf32, #tpu.memory_space<vmem>>, vector<1x1x128xf32>,
    %c0_8 = arith.constant 0 : index
    %c1 = arith.constant 1 : index
    %c0_9 = arith.constant 0 : index
    %12 = vector.load %arg3[%c0_8, %c1, %c0_9] : memref<1x2x128xf32, #tpu.memory_space<vmem>>, vector<1x1x128xf32>
    %13 = vector.shape_cast %12 : vector<1x1x128xf32> to vector<1x128xf32>
    %14 = arith.mulf %3, %3 : vector<8x128xf32>
    %cst_10 = arith.constant dense<0.000000e+00> : vector<128xf32>
    %15 = vector.multi_reduction <add>, %14, %cst_10 [0] : vector<8x128xf32> to vector<128xf32>
    %16 = vector.shape_cast %15 : vector<128xf32> to vector<1x128xf32>
    %17 = arith.addf %13, %16 : vector<1x128xf32>
    %c0_11 = arith.constant 0 : index
    %c1_12 = arith.constant 1 : index
    %c0_13 = arith.constant 0 : index
    %18 = vector.load %arg3[%c0_11, %c1_12, %c0_13] : memref<1x2x128xf32, #tpu.memory_space<vmem>>, vector<1x1x128xf32>
    %19 = vector.shape_cast %18 : vector<1x1x128xf32> to vector<1x128xf32>
    %20 = vector.shape_cast %17 : vector<1x128xf32> to vector<1x1x128xf32>
    tpu.vector_store %arg3[%c0_11, %c1_12, %c0_13], %20 {strides = array<i32>} : memref<1x2x128xf32, #tpu.memory_space<vmem>>, vector<1x1x128xf32>,
    return
  }
  func.func @transform_0(%arg0: i32, %arg1: i32) -> (i32, i32) {
    %c1_i32 = arith.constant 1 : i32
    %0 = arith.muli %arg0, %c1_i32 : i32
    %1 = arith.addi %0, %arg1 : i32
    %c0_i32 = arith.constant 0 : i32
    %c0_i32_0 = arith.constant 0 : i32
    return %1, %c0_i32 : i32, i32
  }
  func.func @transform_1(%arg0: i32, %arg1: i32) -> (i32, i32, i32) {
    %c0_i32 = arith.constant 0 : i32
    %c0_i32_0 = arith.constant 0 : i32
    %c0_i32_1 = arith.constant 0 : i32
    return %arg0, %c0_i32, %c0_i32_0 : i32, i32, i32
  }
}

</mosaic_0001>

<bundles_post_ra>
// kernel: tpu_custom_call.1
= control target key start
LH: loop header
LB: loop body
LE: loop exit
PB: predicated region body
PF: predicated region fallthrough
CT: control target
= control target key end

     0   :  { %6 = vsyncpa [#allocation3], 0  ;;  %s642_s0 = inlined_call_operand.hbm [shape: f32[16,128], index: 0, kind: input, shape index: {}]   ;;  %s643_s1 = inlined_call_operand.hbm [shape: f32[2,2,128], index: 1, kind: output, shape index: {}]  }
   0x1   :  { %8 = vsyncpa [#allocation3 + $0x1], 0 }
   0x2   :  { %9 = vsyncpa [#allocation4], 0 }
   0x3   :  { %11 = vsyncpa [#allocation4 + $0x1], 0  ;;  %s469_s6 = smov 0   ;;  %s471_s7 = smov 0  }
   0x4   :  { %s473_s8 = smov 0   ;;  %s475_s9 = smov 0  }
   0x5   :  { %s477_s10 = smov 0   ;;  %s479_s11 = smov 0  }
   0x6 LB: > { %s266_s12 = sadd.s32 4294967295, %s454_s11   ;;  %s267_s13 = sadd.s32 4294967294, %s454_s11   ;;  %s454_s11 = sphi %s479_s11, %s17_s11   ;;  %s450_s10 = sphi %s477_s10, %s659_s10   ;;  %s446_s9 = sphi %s475_s9, %s658_s9   ;;  %s442_s8 = sphi %s473_s8, %s657_s8   ;;  %s438_s7 = sphi %s471_s7, %s656_s7   ;;  %s434_s6 = sphi %s469_s6, %s655_s6  }
   0x7   : > { %s29_s14 = sadd.s32 1, %s450_s10  ;;  %s38_s15 = sadd.s32 1, %s442_s8 }
   0x8   : > { %p31_p0 = scmp.ge.s32.totalorder %s29_s14, 2  ;;  %p45_p1 = scmp.ne.s32.totalorder %s442_s8, %s438_s7 }
   0x9   : > { %p46_p2 = scmp.eq.s32.totalorder %s454_s11, 0  ;;  %p51_p3 = scmp.ne.s32.totalorder %s438_s7, %s434_s6 }
   0xa   : > { %s661_s14 = smov (%p31_p0, %s29_s14), 0  ;;  %p52_p5 = scmp.eq.s32.totalorder %s266_s12, 0 }
   0xb   : > { %p510_p4 = por %p46_p2, %p45_p1  ;;  %s35_s17 = ssub.s32 %s450_s10, %s661_s14 }
   0xc   : > { %p75_p6 = scmp.eq.s32.totalorder %s266_s12, 1  ;;  %p36_p7 = scmp.eq.s32.totalorder %s35_s17, 0 }
   0xd   : > { %p516_p8 = por %p52_p5, %p51_p3  ;;  %p81_p10 = scmp.eq.s32.totalorder %s267_s13, 1 }
   0xe   : > { %p520_p9 = por %p75_p6, %p45_p1  ;;  %p291_p13 = scmp.lt.s32.totalorder %s454_s11, 2 }
   0xf   : > { %s525_s20 = scalar_select %p36_p7, %s442_s8, %s38_s15  }
  0x10   : > { %s647_s19 = scalar_select %p520_p9, 1, 0 }
  0x11   : > { %p527_p11 = por %p81_p10, %p51_p3  ;;  %s101_s22 = sand.u32 1, %s442_s8  }
  0x12   : > { %s270_s23 = sshll.u32 %s101_s22, 3  ;;  %s271_s24 = sshll.u32 %s450_s10, 7 }
  0x13   : > { %s648_s21 = scalar_select %p527_p11, 1, 0 }
  0x14   : > { %s538_s27 = scalar_lea.hbm %s642_s0, %s271_s24  ;;  %s105_s28 = scalar_lea.vmem [#allocation2], %s270_s23 }
  0x15   : > { %s113_s29 = sshll.u32 %s105_s28, 4  ;;  %p544_p0 = pnand %p291_p13, %p510_p4  ;;  %s540_s29 = int_to_ptr.vmem [resolvable:$true] %s113_s29 }
  0x16   : > { %s102_s2 = scalar_lea.sflag [#allocation3], %s101_s22  ;;  %s342_s3 = scalar_lea.hbm %s538_s27, 128 }
  0x17   : > { %p343_p3 = scmp.ne.s32.totalorder %s538_s27, %s342_s3  ;;  %p344_p5 = pneg %p544_p0 }
  0x18   : > { %s347_s12 = scalar_lea.hbm %s642_s0, 256  ;;  %p348_p4 = scmp.lt.u32.totalorder %s538_s27, %s642_s0 }
  0x19   : > { %p345_p6 = pnand %p344_p5, %p343_p3  ;;  %p349_p10 = scmp.lt.u32.totalorder %s347_s12, %s342_s3 }
  0x1a   : > { %p351_p12 = scmp.lt.u32.totalorder %s342_s3, %s538_s27 }
  0x1b   : > { %p346_p7 = pneg %p345_p6  ;;  %p350_p13 = por %p349_p10, %p348_p4 }
  0x1d   : > { %p352_p1 = por %p351_p12, %p350_p13 }
  0x1f   : > { %p353_p2 = pnand %p352_p1, %p346_p7 }
  0x21   : > { %356 = shalt.err (!%p353_p2)
}
  0x22   : > { %s357_s16 = scalar_lea.vmem %s540_s29, 128  ;;  %s456_s17 = smov [#allocation2]  }
  0x23   : > { %p358_p3 = scmp.ne.s32.totalorder %s540_s29, %s357_s16  ;;  %s362_s22 = sshll.u32 %s456_s17, 4  ;;  %s363_s22 = int_to_ptr.vmem [resolvable:$false] %s362_s22 }
  0x24   : > { %s364_s23 = scalar_lea.vmem %s363_s22, 256  ;;  %p365_p9 = scmp.lt.s32.totalorder %s540_s29, %s363_s22 }
  0x25   : > { %p360_p6 = pnand %p358_p3, %p344_p5  ;;  %p366_p4 = scmp.lt.s32.totalorder %s364_s23, %s357_s16 }
  0x27   : > { %p361_p11 = pneg %p360_p6  ;;  %p367_p10 = por %p366_p4, %p365_p9 }
  0x29   : > { %p368_p12 = pnand %p367_p10, %p361_p11 }
  0x2b   : > { %371 = shalt.err (!%p368_p12)
}
  0x2c   : > { %286 = dma.hbm_to_vmem [thread:$0]  (!%p544_p0), %s538_s27, 128, %s540_s29, %s102_s2  }
  0x2d   : > { %p650_p1 = scmp.lt.s32.totalorder %s454_s11, 3  ;;  %p651_p2 = scmp.ge.s32.totalorder %s454_s11, 1 }
  0x2f   : > { %p119_p5 = pnand %p651_p2, %p650_p1 }
  0x30   : > { %s580_s24 = sand.u32 (!%p119_p5), 1, %s438_s7  }
  0x31   : > { %122 = sbr.rel (%p119_p5) target bundleno = 88 (0x58), region = 24  ;;  %s273_s25 = sshll.u32 (!%p119_p5), %s580_s24, 3 }
  0x32   : > { %s125_s26 = scalar_lea.sflag (!%p119_p5), [#allocation3], %s580_s24  ;;  %s128_s28 = scalar_lea.vmem (!%p119_p5), [#allocation2], %s273_s25 }
  0x38   : > { %425 = dma.done.wait (%p516_p8), %s125_s26, 128  }
  0x39   : > { %427 = vsyncadd (%p516_p8), %s125_s26, 4294967168  ;;  %s274_s27 = sshll.u32 %s580_s24, 1  ;;  %v457_v0 = vmov 0.0   ;;  %v153_v1 = vld [vmem:[%s128_s28] sm:$0xff]  ;;  %s276_s18 = sshll.u32 %s446_s9, 5 }
  0x3a   : > { %s146_s29 = scalar_lea.vmem [#allocation5], %s274_s27  ;;  %v155_v2 = vrot.slane %v153_v1, 4  ;;  %v164_v3 = vmul.f32 %v153_v1, %v153_v1  ;;  %s593_s4 = scalar_lea.hbm %s643_s1, %s276_s18 }
  0x3b   : > { %152 = vst [vmem:[%s146_s29] sm:$0x3] %v457_v0  ;;  %s187_s30 = sshll.u32 %s146_s29, 4  ;;  %s174_s5 = scalar_lea.sflag [#allocation4], %s580_s24  ;;  %s595_s30 = int_to_ptr.vmem [resolvable:$true] %s187_s30 }
  0x3c   : > { %v156_v4 = vadd.f32 %v155_v2, %v153_v1  ;;  %v165_v5 = vrot.slane %v164_v3, 4  ;;  %s372_s12 = scalar_lea.vmem %s595_s30, 32  ;;  %p652_p9 = scmp.ne.s32.totalorder %s647_s19, 0 }
  0x3d   : > { %p373_p8 = scmp.ne.s32.totalorder %s595_s30, %s372_s12  ;;  %s458_s9 = smov [#allocation5]  }
  0x3e   : > { %v157_v6 = vrot.slane %v156_v4, 2  ;;  %v166_v7 = vadd.f32 %v165_v5, %v164_v3  ;;  %s376_s13 = sshll.u32 %s458_s9, 4  ;;  %s377_s13 = int_to_ptr.vmem [resolvable:$false] %s376_s13 }
  0x3f   : > { %p374_p11 = pnand %p373_p8, %p652_p9  ;;  %s378_s15 = scalar_lea.vmem %s377_s13, 64 }
  0x40   : > { %v158_v8 = vadd.f32 %v157_v6, %v156_v4  ;;  %v167_v9 = vrot.slane %v166_v7, 2  ;;  %p379_p7 = scmp.lt.s32.totalorder %s595_s30, %s377_s13  ;;  %p380_p13 = scmp.lt.s32.totalorder %s378_s15, %s372_s12 }
  0x41   : > { %p375_p0 = pneg %p374_p11 }
  0x42   : > { %v159_v10 = vrot.slane %v158_v8, 1  ;;  %v168_v11 = vadd.f32 %v167_v9, %v166_v7  ;;  %v154_v12 = vld [vmem:[%s146_s29] sm:$0x1]  ;;  %v163_v15 = vld [vmem:[%s146_s29 + $0x1] sm:$0x1]  ;;  %p381_p3 = por %p380_p13, %p379_p7 }
  0x44   : > { %v160_v13 = vadd.f32 %v159_v10, %v158_v8  ;;  %v169_v14 = vrot.slane %v168_v11, 1  ;;  %p382_p6 = pnand %p381_p3, %p375_p0 }
  0x46   : > { %v161_v16 = vadd.f32 %v160_v13, %v154_v12  ;;  %v170_v17 = vadd.f32 %v169_v14, %v168_v11 }
  0x48   : > { %162 = vst [vmem:[%s146_s29] sm:$0x1] %v161_v16  ;;  %v171_v18 = vadd.f32 %v170_v17, %v163_v15 }
  0x4a   : > { %172 = vst [vmem:[%s146_s29 + $0x1] sm:$0x1] %v171_v18 }
  0x4b   : > { %385 = shalt.err (!%p382_p6)
}
  0x4c   : > { %s386_s16 = scalar_lea.hbm %s593_s4, 32  ;;  %s390_s23 = scalar_lea.hbm %s643_s1, 64 }
  0x4d   : > { %p387_p4 = scmp.ne.s32.totalorder %s593_s4, %s386_s16  ;;  %p391_p1 = scmp.lt.u32.totalorder %s593_s4, %s643_s1 }
  0x4e   : > { %p392_p2 = scmp.lt.u32.totalorder %s390_s23, %s386_s16  ;;  %p394_p8 = scmp.lt.u32.totalorder %s386_s16, %s593_s4 }
  0x4f   : > { %p388_p10 = pnand %p387_p4, %p652_p9 }
  0x50   : > { %p393_p5 = por %p392_p2, %p391_p1 }
  0x51   : > { %p389_p12 = pneg %p388_p10 }
  0x52   : > { %p395_p11 = por %p394_p8, %p393_p5 }
  0x54   : > { %p396_p0 = pnand %p395_p11, %p389_p12 }
  0x56   : > { %399 = shalt.err (!%p396_p0)
}
  0x57   : > { %281 = dma.vmem_to_hbm [thread:$0]  (%p652_p9), %s595_s30, 32, %s593_s4, %s174_s5  }
  0x58 PF: > { %s199_s26 = sand.u32 1, %s434_s6   ;;  %p653_p7 = scmp.ne.s32.totalorder %s648_s21, 0 }
  0x59   : > { %p654_p13 = scmp.ge.s32.totalorder %s454_s11, 2  ;;  %s200_s28 = scalar_lea.sflag [#allocation4], %s199_s26 }
  0x5b   : > { %p288_p3 = pnand %p654_p13, %p653_p7 }
  0x5d   : > { %429 = dma.done.wait (!%p288_p3), %s200_s28, 32  }
  0x5e   : > { %431 = vsyncadd (!%p288_p3), %s200_s28, 4294967264  ;;  %s17_s11 = sadd.s32 1, %s454_s11   ;;  %s655_s6 = smov %s438_s7 }
  0x5f   : > { %p14_p6 = scmp.ge.s32.totalorder %s17_s11, 4   ;;  %s656_s7 = smov %s442_s8 }
  0x60   : > { %s657_s8 = smov %s525_s20  ;;  %s658_s9 = smov %s450_s10 }
  0x61   : > { %s659_s10 = smov %s661_s14  ;;  %16 = sbr.rel (!%p14_p6) target bundleno = 6 (0x6), region = 73 }
  0x68   :  { %205 = vsyncpa [#allocation3], 1 }
  0x69   :  { %207 = vsyncpa [#allocation3 + $0x1], 1 }
  0x6a   :  { %208 = vsyncpa [#allocation4], 1 }
  0x6b   :  { %210 = vsyncpa [#allocation4 + $0x1], 1 }

</bundles_post_ra>
